<compile_context>
chip_gen: v7x
topology: tpu7x:2x2x1
jax: 0.10.0
libtpu: 0.0.40
codegen_flags: <defaults>
</compile_context>

<pallas_src>
import functools

import jax
import jax.numpy as jnp
from jax.experimental import pallas as pl
from jax.experimental.pallas import tpu as pltpu


def _round_up(n, m):
    return (n + m - 1) // m * m


def _cdiv(a, b):
    return (a + b - 1) // b


def mlp_kernel(x_ref, w1_ref, b1_ref, w2_ref, b2_ref, w3_ref, b3_ref,
               w4_ref, b4_ref, o_ref):
    """Whole forward pass on one batch tile, all in VMEM.

    x_ref: (tile_b, 784) f32 (cast to bf16 here); weights bf16 (hidden padded to 128);
    biases f32 (1, 128); output (tile_b, 128) bf16.
    """
    x = x_ref[...].astype(jnp.bfloat16)
    # fc1 + relu (bf16 MXU inputs, f32 accumulation, f32 bias / elementwise)
    h = jnp.dot(x, w1_ref[...], preferred_element_type=jnp.float32) + b1_ref[...]
    h = jnp.maximum(h, 0.0).astype(jnp.bfloat16)
    # fc2 + relu
    h = jnp.dot(h, w2_ref[...], preferred_element_type=jnp.float32) + b2_ref[...]
    h = jnp.maximum(h, 0.0).astype(jnp.bfloat16)
    # fc3 + relu
    h = jnp.dot(h, w3_ref[...], preferred_element_type=jnp.float32) + b3_ref[...]
    h = jnp.maximum(h, 0.0).astype(jnp.bfloat16)
    # fc4 (logits, padded to 128 lanes; padded lanes get bias -1e30)
    logits = jnp.dot(h, w4_ref[...], preferred_element_type=jnp.float32) + b4_ref[...]
    # stable log_softmax along the feature axis (padded lanes contribute exp(..)=0)
    m = jnp.max(logits, axis=-1, keepdims=True)
    shifted = logits - m
    lse = jnp.log(jnp.sum(jnp.exp(shifted), axis=-1, keepdims=True))
    o_ref[...] = (shifted - lse).astype(o_ref.dtype)


@functools.partial(jax.jit, static_argnames=("tile_b",))
def net_forward(x, params, tile_b=1024):
    """Runs the full MLP forward. x: (B, 784) f32. Returns (B, 10) f32 log-probs."""
    (w1, b1), (w2, b2), (w3, b3), (w4, b4) = params
    B, D_in = x.shape
    H = w1.shape[1]
    D_out = w4.shape[1]
    LANES = 128
    H_p = _round_up(H, LANES)
    D_out_p = _round_up(D_out, LANES)

    # Lane-dense weight prep (tiny arrays, negligible cost):
    #  * hidden width padded 64 -> 128 with zeros: padded units are relu(0)=0 and the
    #    corresponding input rows of the next layer are zero, so they are inert.
    #  * fc4 output padded to 128 lanes with bias -1e30 so the padded lanes vanish
    #    in the softmax normalization (exp underflows to exactly 0 in f32).
    w1p = jnp.pad(w1, ((0, 0), (0, H_p - H))).astype(jnp.bfloat16)
    b1p = jnp.pad(b1.astype(jnp.float32), ((0, 0), (0, H_p - H)))
    w2p = jnp.pad(w2, ((0, H_p - H), (0, H_p - H))).astype(jnp.bfloat16)
    b2p = jnp.pad(b2.astype(jnp.float32), ((0, 0), (0, H_p - H)))
    w3p = jnp.pad(w3, ((0, H_p - H), (0, H_p - H))).astype(jnp.bfloat16)
    b3p = jnp.pad(b3.astype(jnp.float32), ((0, 0), (0, H_p - H)))
    w4p = jnp.pad(w4, ((0, H_p - H), (0, D_out_p - D_out))).astype(jnp.bfloat16)
    b4p = jnp.pad(b4.astype(jnp.float32), ((0, 0), (0, D_out_p - D_out)),
                  constant_values=-1e30)

    # Batch tile: large (kernel is HBM-streaming bound). No batch padding: grid uses
    # cdiv; Pallas masks the ragged final block (OOB reads padded per-row, OOB output
    # writes dropped; all rows are independent so no contamination).
    tile = min(tile_b, _round_up(B, 16))
    # v7x has 2 TensorCores: keep at least two "parallel" grid steps on large batches
    # so the batch axis can be sharded across both cores.
    if B >= 512:
        tile = min(tile, _round_up(_cdiv(B, 2), 16))
    tile = max(16, _round_up(tile, 16))
    grid = (_cdiv(B, tile),)

    # Weights / biases: whole-array VMEM residents (no per-step blocking / double buffers).
    vmem_full = pl.BlockSpec(memory_space=pltpu.MemorySpace.VMEM)

    out = pl.pallas_call(
        mlp_kernel,
        out_shape=jax.ShapeDtypeStruct((B, D_out_p), jnp.bfloat16),
        grid_spec=pltpu.PrefetchScalarGridSpec(
            num_scalar_prefetch=0,
            grid=grid,
            in_specs=[
                pl.BlockSpec((tile, D_in), lambda i: (i, 0)),   # x tile (f32, streamed)
                vmem_full, vmem_full,                           # fc1: w, b
                vmem_full, vmem_full,                           # fc2: w, b
                vmem_full, vmem_full,                           # fc3: w, b
                vmem_full, vmem_full,                           # fc4: w (padded), b (padded)
            ],
            out_specs=pl.BlockSpec((tile, D_out_p), lambda i: (i, 0)),
        ),
        compiler_params=pltpu.CompilerParams(
            dimension_semantics=("parallel",)),
    )(x, w1p, b1p, w2p, b2p, w3p, b3p, w4p, b4p)

    # Slice the 10 real classes and return f32 (matches the PyTorch module's output).
    return out[:, :D_out].astype(jnp.float32)


def init_params(key):
    """Deterministic init matching PyTorch Linear shapes.

    nn.Linear(in, out) -> weight (out, in), bias (out). We store weights
    transposed as (in, out) for x @ W, and biases as (1, out) for broadcasting.
    Uses PyTorch-style uniform(-1/sqrt(fan_in), 1/sqrt(fan_in)).
    """
    dims = [(28 * 28, 64), (64, 64), (64, 64), (64, 10)]
    params = []
    for (fan_in, fan_out) in dims:
        key, kw, kb = jax.random.split(key, 3)
        bound = 1.0 / jnp.sqrt(fan_in)
        w = jax.random.uniform(kw, (fan_in, fan_out), jnp.float32, -bound, bound)
        b = jax.random.uniform(kb, (1, fan_out), jnp.float32, -bound, bound)
        params.append((w, b))
    return params


def net_forward_ref(x, params):
    """Pure-JAX f32 reference for verification."""
    (w1, b1), (w2, b2), (w3, b3), (w4, b4) = params
    h = jax.nn.relu(x @ w1 + b1)
    h = jax.nn.relu(h @ w2 + b2)
    h = jax.nn.relu(h @ w3 + b3)
    logits = h @ w4 + b4
    return jax.nn.log_softmax(logits, axis=1)


if __name__ == "__main__":
    key = jax.random.PRNGKey(0)
    key, kx = jax.random.split(key)
    B = 12  # ragged on purpose: exercises the partial final block (masked writes)
    x = jax.random.normal(kx, (B, 28 * 28), jnp.float32)
    params = init_params(key)

    out = net_forward(x, params)
    out = jax.block_until_ready(out)

    ref = net_forward_ref(x, params)
    assert out.shape == (B, 10)
    assert out.dtype == jnp.float32
    # bf16 input/weight stream + bf16 output store with f32 accumulation:
    # loosen tolerance vs the f32 reference.
    assert jnp.allclose(out, ref, atol=1e-1, rtol=5e-2), "mismatch vs JAX reference"
    # log-probs must normalize.
    assert jnp.allclose(jnp.sum(jnp.exp(out), axis=1), 1.0, atol=2e-2)
    print("KERNEL_OK")
</pallas_src>

<mosaic_0001>
module attributes {stable_mosaic.version = 11 : i64} {
  func.func @mlp_kernel(%arg0: i32, %arg1: memref<16x784xf32, #tpu.memory_space<vmem>>, %arg2: memref<784x128xbf16, #tpu.memory_space<vmem>>, %arg3: memref<1x128xf32, #tpu.memory_space<vmem>>, %arg4: memref<128x128xbf16, #tpu.memory_space<vmem>>, %arg5: memref<1x128xf32, #tpu.memory_space<vmem>>, %arg6: memref<128x128xbf16, #tpu.memory_space<vmem>>, %arg7: memref<1x128xf32, #tpu.memory_space<vmem>>, %arg8: memref<128x128xbf16, #tpu.memory_space<vmem>>, %arg9: memref<1x128xf32, #tpu.memory_space<vmem>>, %arg10: memref<16x128xbf16, #tpu.memory_space<vmem>>) attributes {dimension_semantics = [#tpu.dimension_semantics<parallel>], iteration_bounds = array<i64: 1>, scalar_prefetch = 0 : i64, scratch_operands = 0 : i64, tpu.core_type = #tpu.core_type<tc>, window_params = [{transform_indices = @transform_0, window_bounds = array<i64: 16, 784>}, {pipeline_mode = #tpu.pipeline_mode<synchronous>, transform_indices = @transform_1, window_bounds = array<i64: 784, 128>}, {pipeline_mode = #tpu.pipeline_mode<synchronous>, transform_indices = @transform_2, window_bounds = array<i64: 1, 128>}, {pipeline_mode = #tpu.pipeline_mode<synchronous>, transform_indices = @transform_3, window_bounds = array<i64: 128, 128>}, {pipeline_mode = #tpu.pipeline_mode<synchronous>, transform_indices = @transform_4, window_bounds = array<i64: 1, 128>}, {pipeline_mode = #tpu.pipeline_mode<synchronous>, transform_indices = @transform_5, window_bounds = array<i64: 128, 128>}, {pipeline_mode = #tpu.pipeline_mode<synchronous>, transform_indices = @transform_6, window_bounds = array<i64: 1, 128>}, {pipeline_mode = #tpu.pipeline_mode<synchronous>, transform_indices = @transform_7, window_bounds = array<i64: 128, 128>}, {pipeline_mode = #tpu.pipeline_mode<synchronous>, transform_indices = @transform_8, window_bounds = array<i64: 1, 128>}, {transform_indices = @transform_9, window_bounds = array<i64: 16, 128>}]} {
    %c0 = arith.constant 0 : index
    %c0_0 = arith.constant 0 : index
    %0 = vector.load %arg1[%c0, %c0_0] : memref<16x784xf32, #tpu.memory_space<vmem>>, vector<16x784xf32>
    %1 = arith.truncf %0 : vector<16x784xf32> to vector<16x784xbf16>
    %c0_1 = arith.constant 0 : index
    %c0_2 = arith.constant 0 : index
    %2 = vector.load %arg2[%c0_1, %c0_2] : memref<784x128xbf16, #tpu.memory_space<vmem>>, vector<784x128xbf16>
    %cst = arith.constant dense<0.000000e+00> : vector<16x128xf32>
    %3 = tpu.matmul %1, %2, %cst {dimension_numbers = #tpu.dot_dimension_numbers<[1], [0], [0], [1], [0, 0, 1, 1], [], []>} : vector<16x784xbf16>, vector<784x128xbf16>, vector<16x128xf32> -> vector<16x128xf32>
    %c0_3 = arith.constant 0 : index
    %c0_4 = arith.constant 0 : index
    %4 = vector.load %arg3[%c0_3, %c0_4] : memref<1x128xf32, #tpu.memory_space<vmem>>, vector<1x128xf32>
    %5 = vector.broadcast %4 : vector<1x128xf32> to vector<16x128xf32>
    %6 = arith.addf %3, %5 : vector<16x128xf32>
    %cst_5 = arith.constant 0.000000e+00 : f32
    %7 = vector.broadcast %cst_5 : f32 to vector<16x128xf32>
    %8 = arith.maximumf %6, %7 : vector<16x128xf32>
    %9 = arith.truncf %8 : vector<16x128xf32> to vector<16x128xbf16>
    %c0_6 = arith.constant 0 : index
    %c0_7 = arith.constant 0 : index
    %10 = vector.load %arg4[%c0_6, %c0_7] : memref<128x128xbf16, #tpu.memory_space<vmem>>, vector<128x128xbf16>
    %cst_8 = arith.constant dense<0.000000e+00> : vector<16x128xf32>
    %11 = tpu.matmul %9, %10, %cst_8 {dimension_numbers = #tpu.dot_dimension_numbers<[1], [0], [0], [1], [0, 0, 1, 1], [], []>} : vector<16x128xbf16>, vector<128x128xbf16>, vector<16x128xf32> -> vector<16x128xf32>
    %c0_9 = arith.constant 0 : index
    %c0_10 = arith.constant 0 : index
    %12 = vector.load %arg5[%c0_9, %c0_10] : memref<1x128xf32, #tpu.memory_space<vmem>>, vector<1x128xf32>
    %13 = vector.broadcast %12 : vector<1x128xf32> to vector<16x128xf32>
    %14 = arith.addf %11, %13 : vector<16x128xf32>
    %cst_11 = arith.constant 0.000000e+00 : f32
    %15 = vector.broadcast %cst_11 : f32 to vector<16x128xf32>
    %16 = arith.maximumf %14, %15 : vector<16x128xf32>
    %17 = arith.truncf %16 : vector<16x128xf32> to vector<16x128xbf16>
    %c0_12 = arith.constant 0 : index
    %c0_13 = arith.constant 0 : index
    %18 = vector.load %arg6[%c0_12, %c0_13] : memref<128x128xbf16, #tpu.memory_space<vmem>>, vector<128x128xbf16>
    %cst_14 = arith.constant dense<0.000000e+00> : vector<16x128xf32>
    %19 = tpu.matmul %17, %18, %cst_14 {dimension_numbers = #tpu.dot_dimension_numbers<[1], [0], [0], [1], [0, 0, 1, 1], [], []>} : vector<16x128xbf16>, vector<128x128xbf16>, vector<16x128xf32> -> vector<16x128xf32>
    %c0_15 = arith.constant 0 : index
    %c0_16 = arith.constant 0 : index
    %20 = vector.load %arg7[%c0_15, %c0_16] : memref<1x128xf32, #tpu.memory_space<vmem>>, vector<1x128xf32>
    %21 = vector.broadcast %20 : vector<1x128xf32> to vector<16x128xf32>
    %22 = arith.addf %19, %21 : vector<16x128xf32>
    %cst_17 = arith.constant 0.000000e+00 : f32
    %23 = vector.broadcast %cst_17 : f32 to vector<16x128xf32>
    %24 = arith.maximumf %22, %23 : vector<16x128xf32>
    %25 = arith.truncf %24 : vector<16x128xf32> to vector<16x128xbf16>
    %c0_18 = arith.constant 0 : index
    %c0_19 = arith.constant 0 : index
    %26 = vector.load %arg8[%c0_18, %c0_19] : memref<128x128xbf16, #tpu.memory_space<vmem>>, vector<128x128xbf16>
    %cst_20 = arith.constant dense<0.000000e+00> : vector<16x128xf32>
    %27 = tpu.matmul %25, %26, %cst_20 {dimension_numbers = #tpu.dot_dimension_numbers<[1], [0], [0], [1], [0, 0, 1, 1], [], []>} : vector<16x128xbf16>, vector<128x128xbf16>, vector<16x128xf32> -> vector<16x128xf32>
    %c0_21 = arith.constant 0 : index
    %c0_22 = arith.constant 0 : index
    %28 = vector.load %arg9[%c0_21, %c0_22] : memref<1x128xf32, #tpu.memory_space<vmem>>, vector<1x128xf32>
    %29 = vector.broadcast %28 : vector<1x128xf32> to vector<16x128xf32>
    %30 = arith.addf %27, %29 : vector<16x128xf32>
    %cst_23 = arith.constant dense<0xFF800000> : vector<16xf32>
    %31 = vector.multi_reduction <maximumf>, %30, %cst_23 [1] : vector<16x128xf32> to vector<16xf32>
    %32 = vector.shape_cast %31 : vector<16xf32> to vector<16x1xf32>
    %33 = vector.broadcast %32 : vector<16x1xf32> to vector<16x128xf32>
    %34 = arith.subf %30, %33 : vector<16x128xf32>
    %35 = math.exp %34 : vector<16x128xf32>
    %cst_24 = arith.constant dense<0.000000e+00> : vector<16xf32>
    %36 = vector.multi_reduction <add>, %35, %cst_24 [1] : vector<16x128xf32> to vector<16xf32>
    %37 = vector.shape_cast %36 : vector<16xf32> to vector<16x1xf32>
    %38 = math.log %37 : vector<16x1xf32>
    %39 = vector.broadcast %38 : vector<16x1xf32> to vector<16x128xf32>
    %40 = arith.subf %34, %39 : vector<16x128xf32>
    %41 = arith.truncf %40 : vector<16x128xf32> to vector<16x128xbf16>
    %c0_25 = arith.constant 0 : index
    %c0_26 = arith.constant 0 : index
    %42 = vector.load %arg10[%c0_25, %c0_26] : memref<16x128xbf16, #tpu.memory_space<vmem>>, vector<16x128xbf16>
    tpu.vector_store %arg10[%c0_25, %c0_26], %41 {strides = array<i32>} : memref<16x128xbf16, #tpu.memory_space<vmem>>, vector<16x128xbf16>,
    return
  }
  func.func @transform_0(%arg0: i32) -> (i32, i32) {
    %c0_i32 = arith.constant 0 : i32
    %c0_i32_0 = arith.constant 0 : i32
    return %arg0, %c0_i32 : i32, i32
  }
  func.func @transform_1(%arg0: i32) -> (i32, i32) {
    %c0_i32 = arith.constant 0 : i32
    %c0_i32_0 = arith.constant 0 : i32
    %c0_i32_1 = arith.constant 0 : i32
    return %c0_i32, %c0_i32_0 : i32, i32
  }
  func.func @transform_2(%arg0: i32) -> (i32, i32) {
    %c0_i32 = arith.constant 0 : i32
    %c0_i32_0 = arith.constant 0 : i32
    %c0_i32_1 = arith.constant 0 : i32
    return %c0_i32, %c0_i32_0 : i32, i32
  }
  func.func @transform_3(%arg0: i32) -> (i32, i32) {
    %c0_i32 = arith.constant 0 : i32
    %c0_i32_0 = arith.constant 0 : i32
    %c0_i32_1 = arith.constant 0 : i32
    return %c0_i32, %c0_i32_0 : i32, i32
  }
  func.func @transform_4(%arg0: i32) -> (i32, i32) {
    %c0_i32 = arith.constant 0 : i32
    %c0_i32_0 = arith.constant 0 : i32
    %c0_i32_1 = arith.constant 0 : i32
    return %c0_i32, %c0_i32_0 : i32, i32
  }
  func.func @transform_5(%arg0: i32) -> (i32, i32) {
    %c0_i32 = arith.constant 0 : i32
    %c0_i32_0 = arith.constant 0 : i32
    %c0_i32_1 = arith.constant 0 : i32
    return %c0_i32, %c0_i32_0 : i32, i32
  }
  func.func @transform_6(%arg0: i32) -> (i32, i32) {
    %c0_i32 = arith.constant 0 : i32
    %c0_i32_0 = arith.constant 0 : i32
    %c0_i32_1 = arith.constant 0 : i32
    return %c0_i32, %c0_i32_0 : i32, i32
  }
  func.func @transform_7(%arg0: i32) -> (i32, i32) {
    %c0_i32 = arith.constant 0 : i32
    %c0_i32_0 = arith.constant 0 : i32
    %c0_i32_1 = arith.constant 0 : i32
    return %c0_i32, %c0_i32_0 : i32, i32
  }
  func.func @transform_8(%arg0: i32) -> (i32, i32) {
    %c0_i32 = arith.constant 0 : i32
    %c0_i32_0 = arith.constant 0 : i32
    %c0_i32_1 = arith.constant 0 : i32
    return %c0_i32, %c0_i32_0 : i32, i32
  }
  func.func @transform_9(%arg0: i32) -> (i32, i32) {
    %c0_i32 = arith.constant 0 : i32
    %c0_i32_0 = arith.constant 0 : i32
    return %arg0, %c0_i32 : i32, i32
  }
}

</mosaic_0001>

<bundles_post_ra>
// kernel: net_forward.1
= control target key start
LH: loop header
LB: loop body
LE: loop exit
PB: predicated region body
PF: predicated region fallthrough
CT: control target
= control target key end

     0   :  { %v1331_v43 = vmov 0.0   ;;  %vm1332_vm0 = vmmov 0   ;;  %vm453_vm1 = vcmask 130048   ;;  %s1692_s1 = inlined_call_operand.vmem [shape: bf16[784,128], index: 1, kind: input, shape index: {}]   ;;  %s1693_s0 = inlined_call_operand.vmem [shape: f32[12,784], index: 0, kind: input, shape index: {}]   ;;  %s1694_s3 = inlined_call_operand.vmem [shape: bf16[128,128], index: 3, kind: input, shape index: {}]   ;;  %s1695_s5 = inlined_call_operand.vmem [shape: bf16[128,128], index: 5, kind: input, shape index: {}]   ;;  %s1696_s2 = inlined_call_operand.vmem [shape: f32[1,128], index: 2, kind: input, shape index: {}]   ;;  %s1697_s7 = inlined_call_operand.vmem [shape: bf16[128,128], index: 7, kind: input, shape index: {}]   ;;  %s1698_s4 = inlined_call_operand.vmem [shape: f32[1,128], index: 4, kind: input, shape index: {}]   ;;  %s1699_s6 = inlined_call_operand.vmem [shape: f32[1,128], index: 6, kind: input, shape index: {}]   ;;  %s1700_s8 = inlined_call_operand.vmem [shape: f32[1,128], index: 8, kind: input, shape index: {}]   ;;  %s1701_s9 = inlined_call_operand.vmem [shape: bf16[12,128], index: 9, kind: output, shape index: {}]  }
   0x1   :  { %v1250_v0 = vld [vmem:[%s1692_s1 + $0x40] sm:$0xff]   ;;  %v1254_v4 = vld [vmem:[%s1692_s1 + $0x48] sm:$0xff]   ;;  %v1258_v8 = vld [vmem:[%s1692_s1 + $0x50] sm:$0xff]  }
   0x2   :  { %v1251_v1 = vld [vmem:[%s1692_s1] sm:$0xff]   ;;  %1087 = vmatprep.subr.bf16.mxu0 %v1250_v0  ;;  %v1255_v5 = vld [vmem:[%s1692_s1 + $0x8] sm:$0xff]   ;;  %v1259_v9 = vld [vmem:[%s1692_s1 + $0x10] sm:$0xff]  }
   0x3   :  { %v1252_v2 = vld [vmem:[%s1692_s1 + $0xc0] sm:$0xff]   ;;  %1088 = vmatpush3.bf16.msra.mxu0 %v1251_v1  ;;  %v1256_v6 = vld [vmem:[%s1692_s1 + $0xc8] sm:$0xff]   ;;  %v1260_v10 = vld [vmem:[%s1692_s1 + $0xd0] sm:$0xff]  }
   0x4   :  { %v1253_v3 = vld [vmem:[%s1692_s1 + $0x80] sm:$0xff]   ;;  %1109 = vmatprep.subr.bf16.mxu1 %v1252_v2  ;;  %1089 = vmatprep.subr.bf16.mxu0 %v1254_v4  ;;  %v1257_v7 = vld [vmem:[%s1692_s1 + $0x88] sm:$0xff]   ;;  %v1261_v11 = vld [vmem:[%s1692_s1 + $0x90] sm:$0xff]  }
   0x5   :  { %1110 = vmatpush3.bf16.msra.mxu1 %v1253_v3  ;;  %v1262_v12 = vld [vmem:[%s1692_s1 + $0x58] sm:$0xff]   ;;  %v1266_v16 = vld [vmem:[%s1692_s1 + $0x60] sm:$0xff]   ;;  %v1270_v20 = vld [vmem:[%s1692_s1 + $0x68] sm:$0xff]  }
   0x6   :  { %1111 = vmatprep.subr.bf16.mxu1 %v1256_v6  ;;  %v1263_v13 = vld [vmem:[%s1692_s1 + $0x18] sm:$0xff]   ;;  %v1267_v17 = vld [vmem:[%s1692_s1 + $0x20] sm:$0xff]   ;;  %v1271_v21 = vld [vmem:[%s1692_s1 + $0x28] sm:$0xff]  }
   0x7   :  { %1090 = vmatpush3.bf16.msra.mxu0 %v1255_v5  ;;  %v1264_v14 = vld [vmem:[%s1692_s1 + $0xd8] sm:$0xff]   ;;  %v1268_v18 = vld [vmem:[%s1692_s1 + $0xe0] sm:$0xff]   ;;  %v1272_v22 = vld [vmem:[%s1692_s1 + $0xe8] sm:$0xff]  }
   0x8   :  { %1091 = vmatprep.subr.bf16.mxu0 %v1258_v8  ;;  %v1265_v15 = vld [vmem:[%s1692_s1 + $0x98] sm:$0xff]   ;;  %v1269_v19 = vld [vmem:[%s1692_s1 + $0xa0] sm:$0xff]   ;;  %v1273_v23 = vld [vmem:[%s1692_s1 + $0xa8] sm:$0xff]  }
   0x9   :  { %1112 = vmatpush3.bf16.msra.mxu1 %v1257_v7  ;;  %v1274_v24 = vld [vmem:[%s1692_s1 + $0x70] sm:$0xff]   ;;  %v1278_v28 = vld [vmem:[%s1692_s1 + $0x78] sm:$0xff]   ;;  %v34_v31 = vld [vmem:[%s1693_s0 + $0x8] sm:$0xff] }
   0xa   :  { %1113 = vmatprep.subr.bf16.mxu1 %v1260_v10  ;;  %v1275_v25 = vld [vmem:[%s1692_s1 + $0x30] sm:$0xff]   ;;  %v1279_v29 = vld [vmem:[%s1692_s1 + $0x38] sm:$0xff]   ;;  %v41_v32 = vld [vmem:[%s1693_s0 + $0x40] sm:$0xff] }
   0xb   :  { %1092 = vmatpush3.bf16.msra.mxu0 %v1259_v9  ;;  %v1276_v26 = vld [vmem:[%s1692_s1 + $0xf0] sm:$0xff]   ;;  %v1280_v30 = vld [vmem:[%s1692_s1 + $0xf8] sm:$0xff]   ;;  %v48_v33 = vpack.c.bf16 %v41_v32, %v34_v31  ;;  %v33_v35 = vld [vmem:[%s1693_s0] sm:$0xff] }
   0xc   :  { %1093 = vmatprep.subr.bf16.mxu0 %v1262_v12  ;;  %v1277_v27 = vld [vmem:[%s1692_s1 + $0xb0] sm:$0xff]   ;;  %v1281_v34 = vld [vmem:[%s1692_s1 + $0xb8] sm:$0xff]   ;;  %v1282_v38 = vld [vmem:[%s1692_s1 + $0x140] sm:$0xff]  }
   0xd   :  { %1114 = vmatpush3.bf16.msra.mxu1 %v1261_v11  ;;  %v40_v36 = vld [vmem:[%s1693_s0 + $0x38] sm:$0xff]  ;;  %489 = vmatprep.mubr.bf16.mxu0 %v48_v33  ;;  %v43_v40 = vld [vmem:[%s1693_s0 + $0x50] sm:$0xff]  ;;  %v1283_v42 = vld [vmem:[%s1692_s1 + $0x100] sm:$0xff]  }
   0xe   :  { %1115 = vmatprep.subr.bf16.mxu1 %v1264_v14  ;;  %v47_v37 = vpack.c.bf16 %v40_v36, %v33_v35  ;;  %v36_v39 = vld [vmem:[%s1693_s0 + $0x18] sm:$0xff]  ;;  %v35_v44 = vld [vmem:[%s1693_s0 + $0x10] sm:$0xff]  ;;  %v42_v45 = vld [vmem:[%s1693_s0 + $0x48] sm:$0xff] }
   0xf   :  { %1094 = vmatpush3.bf16.msra.mxu0 %v1263_v13  ;;  %v50_v41 = vpack.c.bf16 %v43_v40, %v36_v39  ;;  %v49_v46 = vpack.c.bf16 %v42_v45, %v35_v44  ;;  %v1284_v47 = vld [vmem:[%s1692_s1 + $0x148] sm:$0xff]   ;;  %v1286_v49 = vld [vmem:[%s1692_s1 + $0x150] sm:$0xff]   ;;  %v1288_v51 = vld [vmem:[%s1692_s1 + $0x158] sm:$0xff]  }
  0x10   :  { %1095 = vmatprep.subr.bf16.mxu0 %v1266_v16  ;;  %v1285_v48 = vld [vmem:[%s1692_s1 + $0x108] sm:$0xff]   ;;  %v1287_v50 = vld [vmem:[%s1692_s1 + $0x110] sm:$0xff]   ;;  %v1289_v52 = vld [vmem:[%s1692_s1 + $0x118] sm:$0xff]  }
  0x11   :  { %1116 = vmatpush3.bf16.msra.mxu1 %v1265_v15  ;;  %530 = vmatprep.mubr.bf16.mxu1 %v50_v41  ;;  %v1290_v53 = vld [vmem:[%s1692_s1 + $0x160] sm:$0xff]   ;;  %v1292_v55 = vld [vmem:[%s1692_s1 + $0x168] sm:$0xff]   ;;  %v39_v61 = vld [vmem:[%s1693_s0 + $0x30] sm:$0xff] }
  0x12   :  { %1117 = vmatprep.subr.bf16.mxu1 %v1268_v18  ;;  %v1291_v54 = vld [vmem:[%s1692_s1 + $0x120] sm:$0xff]   ;;  %v38_v57 = vld [vmem:[%s1693_s0 + $0x28] sm:$0xff]  ;;  %v1294_v63 = vld [vmem:[%s1692_s1 + $0x170] sm:$0xff]  }
  0x13   :  { %1096 = vmatpush3.bf16.msra.mxu0 %v1267_v17  ;;  %v1298_v56 = vld [vmem:[%s1692_s1 + $0x180] sm:$0xff]   ;;  %v1293_v59 = vld [vmem:[%s1692_s1 + $0x128] sm:$0xff]   ;;  %v1295_v1 = vld [vmem:[%s1692_s1 + $0x130] sm:$0xff]  }
  0x14   :  { %1097 = vmatprep.subr.bf16.mxu0 %v1270_v20  ;;  %v45_v58 = vld [vmem:[%s1693_s0 + $0x60] sm:$0xff]  ;;  %v46_v62 = vld [vmem:[%s1693_s0 + $0x68] sm:$0xff]  ;;  %v1296_v2 = vld [vmem:[%s1692_s1 + $0x178] sm:$0xff]  }
  0x15   :  { %1118 = vmatpush3.bf16.msra.mxu1 %v1269_v19  ;;  %v52_v60 = vpack.c.bf16 %v45_v58, %v38_v57  ;;  %v53_v0 = vpack.c.bf16 %v46_v62, %v39_v61  ;;  %v1297_v3 = vld [vmem:[%s1692_s1 + $0x138] sm:$0xff]   ;;  %v37_v4 = vld [vmem:[%s1693_s0 + $0x20] sm:$0xff]  ;;  %v1300_v8 = vld [vmem:[%s1694_s3 + $0x8] sm:$0xff]  }
  0x16   :  { %1119 = vmatprep.subr.bf16.mxu1 %v1272_v22  ;;  %v44_v5 = vld [vmem:[%s1693_s0 + $0x58] sm:$0xff]  ;;  %v1299_v7 = vld [vmem:[%s1694_s3] sm:$0xff]   ;;  %v1301_v9 = vld [vmem:[%s1694_s3 + $0x10] sm:$0xff]  }
  0x17   :  { %1098 = vmatpush3.bf16.msra.mxu0 %v1271_v21  ;;  %v51_v6 = vpack.c.bf16 %v44_v5, %v37_v4  ;;  %v1302_v10 = vld [vmem:[%s1694_s3 + $0x18] sm:$0xff]   ;;  %v1303_v11 = vld [vmem:[%s1694_s3 + $0x20] sm:$0xff]   ;;  %v1304_v12 = vld [vmem:[%s1694_s3 + $0x28] sm:$0xff]  }
  0x18   :  { %1099 = vmatprep.subr.bf16.mxu0 %v1274_v24  ;;  %v1305_v13 = vld [vmem:[%s1694_s3 + $0x30] sm:$0xff]   ;;  %v1306_v14 = vld [vmem:[%s1694_s3 + $0x38] sm:$0xff]   ;;  %v1307_v15 = vld [vmem:[%s1695_s5] sm:$0xff]  }
  0x19   :  { %1120 = vmatpush3.bf16.msra.mxu1 %v1273_v23  ;;  %v1308_v16 = vld [vmem:[%s1695_s5 + $0x8] sm:$0xff]   ;;  %v1309_v17 = vld [vmem:[%s1695_s5 + $0x10] sm:$0xff]   ;;  %v1310_v18 = vld [vmem:[%s1695_s5 + $0x18] sm:$0xff]  }
  0x1a   :  { %1121 = vmatprep.subr.bf16.mxu1 %v1276_v26  ;;  %v1311_v19 = vld [vmem:[%s1695_s5 + $0x20] sm:$0xff]   ;;  %v1312_v20 = vld [vmem:[%s1695_s5 + $0x28] sm:$0xff]   ;;  %v1314_v57 = vld [vmem:[%s1695_s5 + $0x38] sm:$0xff]  }
  0x1b   :  { %1100 = vmatpush3.bf16.msra.mxu0 %v1275_v25  ;;  %v1000_v22 = vld [vmem:[%s1696_s2] ss:$0 sm:$0xff]  ;;  %v1318_v61 = vld [vmem:[%s1697_s7 + $0x18] sm:$0xff]  }
  0x1c   :  { %1101 = vmatprep.subr.bf16.mxu0 %v1278_v28  ;;  %v1315_v58 = vld [vmem:[%s1697_s7] sm:$0xff]  }
  0x1d   :  { %1122 = vmatpush3.bf16.msra.mxu1 %v1277_v27  ;;  %v1319_v62 = vld [vmem:[%s1697_s7 + $0x20] sm:$0xff]  }
  0x1e   :  { %1123 = vmatprep.subr.bf16.mxu1 %v1280_v30 }
  0x1f   :  { %1102 = vmatpush3.bf16.msra.mxu0 %v1279_v29 }
  0x20   :  { %1131 = vmatprep.subr.bf16.mxu0 %v1282_v38 }
  0x21   :  { %1124 = vmatpush3.bf16.msra.mxu1 %v1281_v34 }
  0x22   :  { %1182 = vmatprep.subr.bf16.mxu1 %v1331_v43  ;;  %490 = vmatmul.mubr.bf16.vlgmr.msra.gmra.mrb[0].mxu0 %v47_v37 }
  0x23   :  { %1132 = vmatpush3.bf16.msra.mxu0 %v1283_v42  ;;  %571 = vmatprep.mubr.bf16.mxu0 %v52_v60  ;;  %v1317_v60 = vld [vmem:[%s1697_s7 + $0x10] sm:$0xff]  }
  0x24   :  { %531 = vmatmul.mubr.bf16.vlgmr.msra.gmra.mrb[0].mxu1 %v49_v46  ;;  %1133 = vmatprep.subr.bf16.mxu0 %v1284_v47 }
  0x25   :  { %1184 = vmatprep.mubr.msk.bf16.mxu1 %vm1332_vm0, %v1331_v43  ;;  %1183 = vmatpush3.bf16.msra.mxu1 %v1298_v56  ;;  %v1313_v56 = vld [vmem:[%s1695_s5 + $0x30] sm:$0xff]  }
  0x26   :  { %1188 = vmatprep.subr.bf16.mxu1 %v1331_v43 }
  0x27   :  { %1134 = vmatpush3.bf16.msra.mxu0 %v1285_v48 }
  0x28   :  { %1135 = vmatprep.subr.bf16.mxu0 %v1286_v49 }
  0x2b   :  { %1136 = vmatpush3.bf16.msra.mxu0 %v1287_v50 }
  0x2c   :  { %1137 = vmatprep.subr.bf16.mxu0 %v1288_v51  ;;  %1185 = vmatmul.mubr.msk.bf16.vlgmr.msra.gmra.mrb[4].mxu1 %vm453_vm1, %v53_v0  ;;  %v1051_v0 = vld [vmem:[%s1698_s4] ss:$0 sm:$0xff] }
  0x2d   :  { %1204 = vmatprep.mubr.msk.bf16.mxu1 %vm1332_vm0, %v1331_v43  ;;  %1189 = vmatpush3.bf16.msra.mxu1 %v1299_v7 }
  0x2e   :  { %1190 = vmatprep.subr.bf16.mxu1 %v1331_v43 }
  0x2f   :  { %1138 = vmatpush3.bf16.msra.mxu0 %v1289_v52 }
  0x30   :  { %1139 = vmatprep.subr.bf16.mxu0 %v1290_v53 }
  0x31   :  { %1191 = vmatpush3.bf16.msra.mxu1 %v1300_v8 }
  0x32   :  { %1192 = vmatprep.subr.bf16.mxu1 %v1331_v43 }
  0x33   :  { %1140 = vmatpush3.bf16.msra.mxu0 %v1291_v54 }
  0x34   :  { %1141 = vmatprep.subr.bf16.mxu0 %v1292_v55 }
  0x35   :  { %1193 = vmatpush3.bf16.msra.mxu1 %v1301_v9 }
  0x36   :  { %1194 = vmatprep.subr.bf16.mxu1 %v1331_v43 }
  0x37   :  { %1142 = vmatpush3.bf16.msra.mxu0 %v1293_v59  ;;  %v1316_v59 = vld [vmem:[%s1697_s7 + $0x8] sm:$0xff]  }
  0x38   :  { %1143 = vmatprep.subr.bf16.mxu0 %v1294_v63  ;;  %v1320_v63 = vld [vmem:[%s1697_s7 + $0x28] sm:$0xff]  }
  0x39   :  { %1195 = vmatpush3.bf16.msra.mxu1 %v1302_v10  ;;  %v1321_v10 = vld [vmem:[%s1697_s7 + $0x30] sm:$0xff]  }
  0x3a   :  { %1196 = vmatprep.subr.bf16.mxu1 %v1331_v43 }
  0x3b   :  { %1144 = vmatpush3.bf16.msra.mxu0 %v1295_v1 }
  0x3c   :  { %1145 = vmatprep.subr.bf16.mxu0 %v1296_v2 }
  0x3d   :  { %1197 = vmatpush3.bf16.msra.mxu1 %v1303_v11  ;;  %v1322_v11 = vld [vmem:[%s1697_s7 + $0x38] sm:$0xff]  }
  0x3e   :  { %1198 = vmatprep.subr.bf16.mxu1 %v1331_v43 }
  0x3f   :  { %1146 = vmatpush3.bf16.msra.mxu0 %v1297_v3 }
  0x40   :  { %1208 = vmatprep.subr.bf16.mxu0 %v1331_v43 }
  0x41   :  { %1199 = vmatpush3.bf16.msra.mxu1 %v1304_v12  ;;  %v1060_v12 = vld [vmem:[%s1699_s6] ss:$0 sm:$0xff] }
  0x42   :  { %572 = vmatmul.mubr.bf16.vlgmr.msra.gmra.mrb[4].mxu0 %v51_v6  ;;  %1200 = vmatprep.subr.bf16.mxu1 %v1331_v43 }
  0x43   :  { %1224 = vmatprep.mubr.msk.bf16.mxu0 %vm1332_vm0, %v1331_v43  ;;  %1209 = vmatpush3.bf16.msra.mxu0 %v1307_v15 }
  0x44   :  { %1210 = vmatprep.subr.bf16.mxu0 %v1331_v43 }
  0x45   :  { %1201 = vmatpush3.bf16.msra.mxu1 %v1305_v13 }
  0x46   :  { %1202 = vmatprep.subr.bf16.mxu1 %v1331_v43 }
  0x47   :  { %1211 = vmatpush3.bf16.msra.mxu0 %v1308_v16 }
  0x48   :  { %1212 = vmatprep.subr.bf16.mxu0 %v1331_v43 }
  0x49   :  { %1203 = vmatpush3.bf16.msra.mxu1 %v1306_v14 }
  0x4a   :  { %1228 = vmatprep.subr.bf16.mxu1 %v1331_v43 }
  0x4b   :  { %1213 = vmatpush3.bf16.msra.mxu0 %v1309_v17 }
  0x4c   :  { %1214 = vmatprep.subr.bf16.mxu0 %v1331_v43 }
  0x4f   :  { %1215 = vmatpush3.bf16.msra.mxu0 %v1310_v18 }
  0x50   :  { %1216 = vmatprep.subr.bf16.mxu0 %v1331_v43 }
  0x53   :  { %1217 = vmatpush3.bf16.msra.mxu0 %v1311_v19 }
  0x54   :  { %1218 = vmatprep.subr.bf16.mxu0 %v1331_v43 }
  0x57   :  { %1219 = vmatpush3.bf16.msra.mxu0 %v1312_v20 }
  0x58   :  { %1220 = vmatprep.subr.bf16.mxu0 %v1331_v43 }
  0x5b   :  { %1221 = vmatpush3.bf16.msra.mxu0 %v1313_v56 }
  0x5c   :  { %1222 = vmatprep.subr.bf16.mxu0 %v1331_v43 }
  0x5f   :  { %1223 = vmatpush3.bf16.msra.mxu0 %v1314_v57 }
  0xf5   :  { %v1103_v21 = vpop.f32.mrb[0].mxu0 }
  0xf6   :  { %v1104_v23 = vpop.f32.mrb[1].mxu0 }
  0xf7   :  { %v1105_v24 = vadd.f32 %v1104_v23, %v1103_v21  ;;  %v1106_v25 = vpop.f32.mrb[2].mxu0  ;;  %v1125_v26 = vpop.f32.mrb[0].mxu1 }
  0xf8   :  { %v1107_v27 = vpop.f32.mrb[3].mxu0  ;;  %v1126_v30 = vpop.f32.mrb[1].mxu1 }
  0xf9   :  { %v492_v28 = vadd.f32 %v1105_v24, %v1000_v22  ;;  %v1108_v29 = vadd.f32 %v1107_v27, %v1106_v25  ;;  %v1127_v31 = vadd.f32 %v1126_v30, %v1125_v26  ;;  %v1128_v32 = vpop.f32.mrb[2].mxu1 }
  0xfa   :  { %v1129_v34 = vpop.f32.mrb[3].mxu1 }
  0xfb   :  { %v495_v33 = vadd.f32 %v1108_v29, %v1000_v22  ;;  %v533_v35 = vadd.f32 %v1127_v31, %v492_v28  ;;  %v1130_v36 = vadd.f32 %v1129_v34, %v1128_v32 }
  0xfd   :  { %v536_v37 = vadd.f32 %v1130_v36, %v495_v33 }
  0xff   :  { %v614_v38 = vpop.f32.mrb[4].mxu1 }
 0x100   :  { %v1186_v39 = vpop.f32.mrb[5].mxu1 }
 0x101   :  { %v617_v40 = vpop.f32.mrb[6].mxu1 }
 0x102   :  { %v1187_v41 = vpop.f32.mrb[7].mxu1 }
 0x115   :  { %v1147_v42 = vpop.f32.mrb[4].mxu0 }
 0x116   :  { %v1148_v44 = vpop.f32.mrb[5].mxu0 }
 0x117   :  { %v1149_v45 = vadd.f32 %v1148_v44, %v1147_v42  ;;  %v1150_v46 = vpop.f32.mrb[6].mxu0 }
 0x118   :  { %v1151_v47 = vpop.f32.mrb[7].mxu0 }
 0x119   :  { %v574_v48 = vadd.f32 %v1149_v45, %v533_v35  ;;  %v1152_v49 = vadd.f32 %v1151_v47, %v1150_v46 }
 0x11b   :  { %v615_v50 = vadd.f32 %v614_v38, %v574_v48  ;;  %v577_v51 = vadd.f32 %v1152_v49, %v536_v37 }
 0x11d   :  { %v618_v52 = vadd.f32 %v617_v40, %v577_v51  ;;  %v621_v53 = vmax.f32 %v615_v50, 0.0 }
 0x11f   :  { %v622_v54 = vmax.f32 %v618_v52, 0.0 }
 0x121   :  { %v623_v55 = vpack.c.bf16 %v622_v54, %v621_v53 }
 0x123   :  { %1205 = vmatmul.mubr.bf16.vlgmr.msra.gmra.mrb[8].mxu1 %v623_v55 }
 0x124   :  { %1244 = vmatprep.mubr.msk.bf16.mxu1 %vm1332_vm0, %v1331_v43  ;;  %1229 = vmatpush3.bf16.msra.mxu1 %v1315_v58 }
 0x125   :  { %1230 = vmatprep.subr.bf16.mxu1 %v1331_v43 }
 0x128   :  { %1231 = vmatpush3.bf16.msra.mxu1 %v1316_v59 }
 0x129   :  { %1232 = vmatprep.subr.bf16.mxu1 %v1331_v43 }
 0x12c   :  { %1233 = vmatpush3.bf16.msra.mxu1 %v1317_v60 }
 0x12d   :  { %1234 = vmatprep.subr.bf16.mxu1 %v1331_v43 }
 0x130   :  { %1235 = vmatpush3.bf16.msra.mxu1 %v1318_v61 }
 0x131   :  { %1236 = vmatprep.subr.bf16.mxu1 %v1331_v43 }
 0x134   :  { %1237 = vmatpush3.bf16.msra.mxu1 %v1319_v62 }
 0x135   :  { %1238 = vmatprep.subr.bf16.mxu1 %v1331_v43 }
 0x138   :  { %1239 = vmatpush3.bf16.msra.mxu1 %v1320_v63 }
 0x139   :  { %1240 = vmatprep.subr.bf16.mxu1 %v1331_v43 }
 0x13c   :  { %1241 = vmatpush3.bf16.msra.mxu1 %v1321_v10 }
 0x13d   :  { %1242 = vmatprep.subr.bf16.mxu1 %v1331_v43  ;;  %v1069_v43 = vld [vmem:[%s1700_s8] ss:$0 sm:$0xff] }
 0x140   :  { %1243 = vmatpush3.bf16.msra.mxu1 %v1322_v11 }
 0x1f6   :  { %v729_v1 = vpop.f32.mrb[8].mxu1 }
 0x1f7   :  { %v730_v2 = vadd.f32 %v1051_v0, %v729_v1  ;;  %v1206_v3 = vpop.f32.mrb[9].mxu1 }
 0x1f8   :  { %v732_v4 = vpop.f32.mrb[10].mxu1 }
 0x1f9   :  { %v733_v5 = vadd.f32 %v1051_v0, %v732_v4  ;;  %v1207_v6 = vpop.f32.mrb[11].mxu1  ;;  %v736_v7 = vmax.f32 %v730_v2, 0.0 }
 0x1fb   :  { %v737_v8 = vmax.f32 %v733_v5, 0.0 }
 0x1fd   :  { %v738_v9 = vpack.c.bf16 %v737_v8, %v736_v7 }
 0x1ff   :  { %1225 = vmatmul.mubr.bf16.vlgmr.msra.gmra.mrb[8].mxu0 %v738_v9 }
 0x2d2   :  { %v844_v13 = vpop.f32.mrb[8].mxu0 }
 0x2d3   :  { %v845_v14 = vadd.f32 %v1060_v12, %v844_v13  ;;  %v1226_v15 = vpop.f32.mrb[9].mxu0 }
 0x2d4   :  { %v847_v16 = vpop.f32.mrb[10].mxu0 }
 0x2d5   :  { %v848_v17 = vadd.f32 %v1060_v12, %v847_v16  ;;  %v1227_v18 = vpop.f32.mrb[11].mxu0  ;;  %v851_v19 = vmax.f32 %v845_v14, 0.0 }
 0x2d7   :  { %v852_v20 = vmax.f32 %v848_v17, 0.0 }
 0x2d9   :  { %v853_v21 = vpack.c.bf16 %v852_v20, %v851_v19 }
 0x2db   :  { %1245 = vmatmul.mubr.bf16.vlgmr.msra.gmra.mrb[12].mxu1 %v853_v21 }
 0x3ae   :  { %v959_v22 = vpop.f32.mrb[12].mxu1 }
 0x3af   :  { %v960_v23 = vadd.f32 %v1069_v43, %v959_v22  ;;  %v1246_v24 = vpop.f32.mrb[13].mxu1 }
 0x3b0   :  { %v962_v25 = vpop.f32.mrb[14].mxu1 }
 0x3b1   :  { %966 = vmax.xlane.f32.xlu0 %v960_v23  ;;  %v1247_v26 = vpop.f32.mrb[15].mxu1  ;;  %v963_v27 = vadd.f32 %v1069_v43, %v962_v25 }
 0x3b5   :  { %968 = vmax.xlane.f32.xlu0 %v963_v27 }
 0x43e   :  { %v967_v28 = vpop.xlane.xlu0 %966 }
 0x43f   :  { %v970_v29 = vsub.f32 %v960_v23, %v967_v28 }
 0x441   :  { %v972_v30 = vmul.f32 1.442695, %v970_v29 }
 0x442   :  { %v969_v31 = vpop.xlane.xlu0 %968 }
 0x443   :  { %v971_v32 = vsub.f32 %v963_v27, %v969_v31  ;;  %1323 = vpow2.f32 %v972_v30 }
 0x445   :  { %v974_v33 = vmul.f32 1.442695, %v971_v32 }
 0x447   :  { %1325 = vpow2.f32 %v974_v33 }
 0x44d   :  { %v1324_v34 = vpop.eup %1323 }
 0x44e   :  { %976 = vadd.xlane.f32.xlu1 %v1324_v34 }
 0x451   :  { %v1326_v35 = vpop.eup %1325 }
 0x452   :  { %978 = vadd.xlane.f32.xlu1 %v1326_v35 }
 0x4db   :  { %v977_v36 = vpop.xlane.xlu1 %976 }
 0x4dc   :  { %1327 = vlog2.f32 %v977_v36 }
 0x4df   :  { %v979_v37 = vpop.xlane.xlu1 %978 }
 0x4e0   :  { %1329 = vlog2.f32 %v979_v37 }
 0x4e6   :  { %v1328_v38 = vpop.eup %1327 }
 0x4e7   :  { %v981_v39 = vmul.f32 0.6931472, %v1328_v38 }
 0x4e9   :  { %v984_v42 = vsub.f32 %v970_v29, %v981_v39 }
 0x4ea   :  { %v1330_v40 = vpop.eup %1329 }
 0x4eb   :  { %v983_v41 = vmul.f32 0.6931472, %v1330_v40 }
 0x4ed   :  { %v985_v44 = vsub.f32 %v971_v32, %v983_v41 }
 0x4ef   :  { %v1085_v45 = vpack.c.bf16 %v985_v44, %v984_v42 }
 0x4f1   :  { %1086 = vst [vmem:[%s1701_s9] sm:$0xff] %v1085_v45  }

</bundles_post_ra>
